<compile_context>
chip_gen: v6e
topology: v6e:2x2x1
jax: 0.10.0
libtpu: 0.0.40
codegen_flags: <defaults>
</compile_context>

<pallas_src>
import jax
import jax.numpy as jnp
from jax import lax
from jax.experimental import pallas as pl
from jax.experimental.pallas import tpu as pltpu

BN_EPS = 1e-5


# ----------------------------- Pallas kernel ---------------------------------
def make_block1d_kernel(num_layers):
    """Whole Block1d (all Factor1d layers) in a single grid step.

    refs = (x, [Win_0, gb_0, Wout_0, ..., Win_{L-1}, gb_{L-1}, Wout_{L-1}], out)
      x     : (B, C0*F0)            flattened NCW input (channel-major columns)
      Win_l : (C_l*F_l, U_l*HD_l)   gather-composed-with-conv0 weights (bf16)
      gb_l  : (2, U_l*HD_l)         BN affine params, row0=gamma, row1=beta (f32)
      Wout_l: (U_l*HD_l, OC_l*U_l)  block-diag conv1 weights, columns c-major (bf16)
      out   : (B, OC_last*U_last)   f32, columns already in (OC, U) order
    """
    def kernel(*refs):
        x_ref, o_ref = refs[0], refs[-1]
        h = x_ref[...]
        for l in range(num_layers):
            win_ref, gb_ref, wout_ref = refs[1 + 3 * l: 4 + 3 * l]

            # GEMM 1 of layer l: (scope gather o conv0), bf16 operands, f32 acc.
            z = jnp.dot(h.astype(win_ref.dtype), win_ref[...],
                        preferred_element_type=jnp.float32)     # (B, U*HD) f32

            # BatchNorm1d (training-mode batch stats over the batch axis; the
            # spatial extent after conv0 is 1), biased variance, folded into a
            # per-column scale/shift.  All BN math stays f32.
            mean = jnp.mean(z, axis=0, keepdims=True)
            var = jnp.maximum(
                jnp.mean(z * z, axis=0, keepdims=True) - mean * mean, 0.0)
            scale = gb_ref[0:1, :] * lax.rsqrt(var + BN_EPS)    # rsqrt -> EUP slot
            shift = gb_ref[1:2, :] - mean * scale
            a = jnp.maximum(z * scale + shift, 0.0)             # BN + ReLU

            # GEMM 2 of layer l: conv1 (kernel_size == 1), block-diagonal; its
            # c-major column order is exactly the next layer's (C, F) order.
            h = jnp.dot(a.astype(wout_ref.dtype), wout_ref[...],
                        preferred_element_type=jnp.float32)
        o_ref[...] = h
    return kernel


def block1d_pallas(x, packed):
    """x: (B, C_in, F_in)  ->  (B, OC_last, U_last), one fused pallas_call."""
    layers = packed["layers"]
    B = x.shape[0]
    xflat = x.reshape(B, -1).astype(layers[0]["Win"].dtype)

    operands = [xflat]
    in_specs = [pl.BlockSpec(xflat.shape, lambda i: (0, 0))]
    flops = 0
    transcendentals = 0
    bytes_accessed = xflat.size * xflat.dtype.itemsize
    for lp in layers:
        for name in ("Win", "gb", "Wout"):
            arr = lp[name]
            operands.append(arr)
            in_specs.append(pl.BlockSpec(arr.shape, lambda i: (0, 0)))
            bytes_accessed += arr.size * arr.dtype.itemsize
        U, HD, OC = lp["U"], lp["HD"], lp["OC"]
        # Real (block-sparse) work only - not the densified zero blocks.
        flops += 2 * B * lp["nnz_in"] * HD          # gather o conv0
        flops += 2 * B * U * HD * OC                # conv1 (k=1)
        flops += 8 * B * U * HD                     # BN fold + ReLU (VPU)
        transcendentals += U * HD                   # rsqrt per BN column

    OC_last, U_last = layers[-1]["OC"], layers[-1]["U"]
    OCU = OC_last * U_last
    bytes_accessed += B * OCU * 4

    out_flat = pl.pallas_call(
        make_block1d_kernel(len(layers)),
        out_shape=jax.ShapeDtypeStruct((B, OCU), jnp.float32),
        grid_spec=pltpu.PrefetchScalarGridSpec(
            num_scalar_prefetch=0,
            grid=(1,),
            in_specs=in_specs,
            out_specs=pl.BlockSpec((B, OCU), lambda i: (0, 0)),
        ),
        compiler_params=pltpu.CompilerParams(
            # One fused step: at demo size the kernel is launch/DMA-latency
            # bound, which the full-block fusion addresses directly.
            # TODO(synk): once B (or U via unit-group weight tiling) is large
            # enough to need >1 grid step, mark the independent axis "parallel"
            # so v7x's second TensorCore picks up half the steps.
            dimension_semantics=("arbitrary",),
        ),
        cost_estimate=pl.CostEstimate(
            flops=int(flops),
            transcendentals=int(transcendentals),
            bytes_accessed=int(bytes_accessed),
        ),
    )(*operands)
    return out_flat.reshape(B, OC_last, U_last)     # columns are c-major already


# ------------------------- parameter construction ----------------------------
def init_factor1d_params(key, projection, in_channels, hidden_dim, out_channels):
    U = len(projection)
    assert sorted(projection.keys()) == list(range(U))
    Kmax = max(len(projection[k]) for k in range(U))
    idx_rows, mask_rows = [], []
    for k in range(U):
        v = list(projection[k])
        pad = Kmax - len(v)
        idx_rows.append(v + [0] * pad)
        mask_rows.append([1.0] * len(v) + [0.0] * pad)
    idx = jnp.array(idx_rows, jnp.int32)                      # (U, Kmax)
    mask = jnp.array(mask_rows, jnp.float32)                  # (U, Kmax)

    k0, k1, k2, k3 = jax.random.split(key, 4)
    # PyTorch Factor1d default: bias=False for both convs (no bias terms here).
    w0 = 0.3 * jax.random.normal(k0, (U, hidden_dim, in_channels, Kmax),
                                 jnp.float32)
    w0 = w0 * mask[:, None, None, :]                          # zero padded taps
    gamma = 1.0 + 0.1 * jax.random.normal(k1, (U, hidden_dim), jnp.float32)
    beta = 0.1 * jax.random.normal(k2, (U, hidden_dim), jnp.float32)
    w1 = 0.3 * jax.random.normal(k3, (U, out_channels, hidden_dim), jnp.float32)

    nnz_in = int(sum(len(projection[k]) for k in range(U))) * in_channels
    return dict(idx=idx, mask=mask, w0=w0, gamma=gamma, beta=beta, w1=w1,
                in_channels=in_channels, hidden_dim=hidden_dim,
                out_channels=out_channels, nnz_in=nnz_in)


def pack_block1d(layer_params, in_channels, in_features, dtype=jnp.bfloat16):
    """Pre-pack all kernel operands for the fused Block1d kernel (done once).

    Per layer (current feature map is (C, F), column order c*F + f):
      * S[u,t,f] = 1 iff tap t of unit u reads input feature f (valid taps only).
      * Win[c*F+f, u*HD+h] = sum_t w0[u,h,c,t] * S[u,t,f]  -- the scope gather is
        composed exactly into the conv0 weights, so the kernel never gathers.
      * Wout[u*HD+h, c*U+u'] = w1[u,c,h] * [u==u']          -- block-diag conv1,
        c-major columns = the (OC, U) layout the next layer / caller expects.
    """
    C, F = in_channels, in_features
    layers = []
    for p in layer_params:
        U, HD, OC = p["idx"].shape[0], p["hidden_dim"], p["out_channels"]
        S = jax.nn.one_hot(p["idx"], F, dtype=jnp.float32) * p["mask"][..., None]
        Win = jnp.einsum("uhct,utf->cfuh", p["w0"], S).reshape(C * F, U * HD)
        gb = jnp.stack([p["gamma"].reshape(U * HD),
                        p["beta"].reshape(U * HD)], axis=0)   # (2, U*HD) f32
        eye = jnp.eye(U, dtype=jnp.float32)
        Wout = jnp.einsum("uv,uch->uhcv", eye, p["w1"]).reshape(U * HD, OC * U)
        # TODO(synk): at large U the densified Win/Wout carry O(U^2) zeros;
        # switch to per-unit-group diagonal blocks on a grid axis (with
        # pipeline_mode=pl.Buffered(1) single-buffered weights) before the
        # packed weights approach v7x's 64 MiB VMEM, and pad OC*U columns to a
        # multiple of 128 for a lane-dense (unmasked) store.
        # TODO(synk): on v7x, Win/Wout could be stored fp8 (per-block scales)
        # once they are large enough to be bandwidth/VMEM-limiting.
        layers.append(dict(Win=Win.astype(dtype), gb=gb.astype(jnp.float32),
                           Wout=Wout.astype(dtype),
                           U=U, HD=HD, OC=OC, nnz_in=p["nnz_in"]))
        C, F = OC, U
    return dict(layers=layers)


# --------------------------- pure-JAX references ------------------------------
def factor1d_ref(x, p):
    """PyTorch-faithful per-unit f32 reference for one Factor1d layer."""
    idx = p["idx"]
    U, K = idx.shape
    xg = x[:, :, idx]                                           # (B, C, U, K)
    xg = jnp.transpose(xg, (2, 0, 1, 3))                        # (U, B, C, K)
    h = jnp.einsum("ubck,uhck->ubh", xg, p["w0"])
    mean = jnp.mean(h, axis=1, keepdims=True)
    var = jnp.mean((h - mean) ** 2, axis=1, keepdims=True)      # biased var
    hn = (h - mean) / jnp.sqrt(var + BN_EPS)
    hn = hn * p["gamma"][:, None, :] + p["beta"][:, None, :]
    a = jnp.maximum(hn, 0.0)
    o = jnp.einsum("ubh,uoh->ubo", a, p["w1"])
    return jnp.transpose(o, (1, 2, 0))                          # (B, OC, U)


def block1d_ref(x, layer_params):
    for p in layer_params:
        x = factor1d_ref(x, p)
    return x


def block1d_ref_matched(x, packed):
    """Same math/dtype casts as the fused kernel, expressed in plain JAX."""
    layers = packed["layers"]
    B = x.shape[0]
    h = x.reshape(B, -1)
    for lp in layers:
        z = jnp.dot(h.astype(lp["Win"].dtype), lp["Win"],
                    preferred_element_type=jnp.float32)
        mean = jnp.mean(z, axis=0, keepdims=True)
        var = jnp.maximum(jnp.mean(z * z, axis=0, keepdims=True) - mean * mean,
                          0.0)
        scale = lp["gb"][0:1] * lax.rsqrt(var + BN_EPS)
        shift = lp["gb"][1:2] - mean * scale
        a = jnp.maximum(z * scale + shift, 0.0)
        h = jnp.dot(a.astype(lp["Wout"].dtype), lp["Wout"],
                    preferred_element_type=jnp.float32)
    return h.reshape(B, layers[-1]["OC"], layers[-1]["U"])


# ---------------------------------- main --------------------------------------
if __name__ == "__main__":
    key = jax.random.PRNGKey(0)
    kx, kp0, kp1 = jax.random.split(key, 3)

    # Small, module-consistent shapes. B=8 keeps batch-norm statistics
    # well-conditioned and fills a few more MXU rows than B=2 (the workload
    # remains latency-bound; the fusion/byte reductions are the levers here).
    B, C_IN, F_IN = 8, 1, 16
    # Two stacked Factor1d layers (a Block1d), overlapping variable-size scopes.
    proj0 = {0: [0, 1, 2, 3], 1: [2, 3, 4], 2: [4, 5, 6, 7], 3: [7, 8, 9],
             4: [8, 9, 10, 11], 5: [10, 11, 12], 6: [12, 13, 14, 15],
             7: [14, 15, 0]}
    proj1 = {0: [0, 1, 2], 1: [2, 3, 4], 2: [4, 5, 6], 3: [6, 7, 0]}
    hidden_dims = [32, 16]
    out_channels = [4, 2]

    p0 = init_factor1d_params(kp0, proj0, C_IN, hidden_dims[0], out_channels[0])
    p1 = init_factor1d_params(kp1, proj1, out_channels[0], hidden_dims[1],
                              out_channels[1])
    layer_params = [p0, p1]

    packed_bf16 = pack_block1d(layer_params, C_IN, F_IN, dtype=jnp.bfloat16)
    packed_f32 = pack_block1d(layer_params, C_IN, F_IN, dtype=jnp.float32)

    x = jax.random.normal(kx, (B, C_IN, F_IN), jnp.float32)

    # Production path: one fused pallas_call for the whole Block1d, bf16 GEMMs.
    out = jax.block_until_ready(block1d_pallas(x, packed_bf16))
    assert out.shape == (B, out_channels[1], len(proj1)), out.shape

    # Check 1: bf16 fused kernel matches identical bf16 math in plain JAX.
    ref_bf16 = block1d_ref_matched(x, packed_bf16)
    assert jnp.allclose(out, ref_bf16, rtol=2e-3, atol=2e-3), \
        float(jnp.max(jnp.abs(out - ref_bf16)))

    # Check 2: f32-operand fused kernel matches the PyTorch-faithful per-unit
    # f32 reference (validates the gather/BN-fold/block-diag packing exactly).
    out_f32 = jax.block_until_ready(block1d_pallas(x, packed_f32))
    ref_f32 = block1d_ref(x, layer_params)
    assert jnp.allclose(out_f32, ref_f32, rtol=2e-3, atol=2e-3), \
        float(jnp.max(jnp.abs(out_f32 - ref_f32)))

    # TODO(synk): BatchNorm running_mean/running_var buffer updates (in-place
    # training side effect) are not reproduced; forward output does not depend
    # on them in training mode.
    print("KERNEL_OK")
</pallas_src>

<mosaic_0001>
module attributes {stable_mosaic.version = 11 : i64} {
  func.func @kernel(%arg0: i32, %arg1: memref<8x16xbf16, #tpu.memory_space<vmem>>, %arg2: memref<16x256xbf16, #tpu.memory_space<vmem>>, %arg3: memref<2x256xf32, #tpu.memory_space<vmem>>, %arg4: memref<256x32xbf16, #tpu.memory_space<vmem>>, %arg5: memref<32x64xbf16, #tpu.memory_space<vmem>>, %arg6: memref<2x64xf32, #tpu.memory_space<vmem>>, %arg7: memref<64x8xbf16, #tpu.memory_space<vmem>>, %arg8: memref<8x8xf32, #tpu.memory_space<vmem>>) attributes {dimension_semantics = [#tpu.dimension_semantics<arbitrary>], iteration_bounds = array<i64: 1>, scalar_prefetch = 0 : i64, scratch_operands = 0 : i64, tpu.core_type = #tpu.core_type<tc>, window_params = [{pipeline_mode = #tpu.pipeline_mode<synchronous>, transform_indices = @transform_0, window_bounds = array<i64: 8, 16>}, {pipeline_mode = #tpu.pipeline_mode<synchronous>, transform_indices = @transform_1, window_bounds = array<i64: 16, 256>}, {pipeline_mode = #tpu.pipeline_mode<synchronous>, transform_indices = @transform_2, window_bounds = array<i64: 2, 256>}, {pipeline_mode = #tpu.pipeline_mode<synchronous>, transform_indices = @transform_3, window_bounds = array<i64: 256, 32>}, {pipeline_mode = #tpu.pipeline_mode<synchronous>, transform_indices = @transform_4, window_bounds = array<i64: 32, 64>}, {pipeline_mode = #tpu.pipeline_mode<synchronous>, transform_indices = @transform_5, window_bounds = array<i64: 2, 64>}, {pipeline_mode = #tpu.pipeline_mode<synchronous>, transform_indices = @transform_6, window_bounds = array<i64: 64, 8>}, {pipeline_mode = #tpu.pipeline_mode<synchronous>, transform_indices = @transform_7, window_bounds = array<i64: 8, 8>}]} {
    %c0 = arith.constant 0 : index
    %c0_0 = arith.constant 0 : index
    %0 = vector.load %arg1[%c0, %c0_0] : memref<8x16xbf16, #tpu.memory_space<vmem>>, vector<8x16xbf16>
    %c0_1 = arith.constant 0 : index
    %c0_2 = arith.constant 0 : index
    %1 = vector.load %arg2[%c0_1, %c0_2] : memref<16x256xbf16, #tpu.memory_space<vmem>>, vector<16x256xbf16>
    %cst = arith.constant dense<0.000000e+00> : vector<8x256xf32>
    %2 = tpu.matmul %0, %1, %cst {dimension_numbers = #tpu.dot_dimension_numbers<[1], [0], [0], [1], [0, 0, 1, 1], [], []>} : vector<8x16xbf16>, vector<16x256xbf16>, vector<8x256xf32> -> vector<8x256xf32>
    %cst_3 = arith.constant dense<0.000000e+00> : vector<256xf32>
    %3 = vector.multi_reduction <add>, %2, %cst_3 [0] : vector<8x256xf32> to vector<256xf32>
    %4 = vector.shape_cast %3 : vector<256xf32> to vector<1x256xf32>
    %cst_4 = arith.constant 8.000000e+00 : f32
    %5 = vector.broadcast %cst_4 : f32 to vector<1x256xf32>
    %6 = arith.divf %4, %5 : vector<1x256xf32>
    %7 = arith.mulf %2, %2 : vector<8x256xf32>
    %cst_5 = arith.constant dense<0.000000e+00> : vector<256xf32>
    %8 = vector.multi_reduction <add>, %7, %cst_5 [0] : vector<8x256xf32> to vector<256xf32>
    %9 = vector.shape_cast %8 : vector<256xf32> to vector<1x256xf32>
    %cst_6 = arith.constant 8.000000e+00 : f32
    %10 = vector.broadcast %cst_6 : f32 to vector<1x256xf32>
    %11 = arith.divf %9, %10 : vector<1x256xf32>
    %12 = arith.mulf %6, %6 : vector<1x256xf32>
    %13 = arith.subf %11, %12 : vector<1x256xf32>
    %cst_7 = arith.constant 0.000000e+00 : f32
    %14 = vector.broadcast %cst_7 : f32 to vector<1x256xf32>
    %15 = arith.maximumf %13, %14 : vector<1x256xf32>
    %c0_8 = arith.constant 0 : index
    %c0_9 = arith.constant 0 : index
    %16 = vector.load %arg3[%c0_8, %c0_9] : memref<2x256xf32, #tpu.memory_space<vmem>>, vector<1x256xf32>
    %cst_10 = arith.constant 9.99999974E-6 : f32
    %17 = vector.broadcast %cst_10 : f32 to vector<1x256xf32>
    %18 = arith.addf %15, %17 : vector<1x256xf32>
    %19 = math.rsqrt %18 : vector<1x256xf32>
    %20 = arith.mulf %16, %19 : vector<1x256xf32>
    %c1 = arith.constant 1 : index
    %c0_11 = arith.constant 0 : index
    %21 = vector.load %arg3[%c1, %c0_11] : memref<2x256xf32, #tpu.memory_space<vmem>>, vector<1x256xf32>
    %22 = arith.mulf %6, %20 : vector<1x256xf32>
    %23 = arith.subf %21, %22 : vector<1x256xf32>
    %24 = vector.broadcast %20 : vector<1x256xf32> to vector<8x256xf32>
    %25 = arith.mulf %2, %24 : vector<8x256xf32>
    %26 = vector.broadcast %23 : vector<1x256xf32> to vector<8x256xf32>
    %27 = arith.addf %25, %26 : vector<8x256xf32>
    %cst_12 = arith.constant 0.000000e+00 : f32
    %28 = vector.broadcast %cst_12 : f32 to vector<8x256xf32>
    %29 = arith.maximumf %27, %28 : vector<8x256xf32>
    %30 = arith.truncf %29 : vector<8x256xf32> to vector<8x256xbf16>
    %c0_13 = arith.constant 0 : index
    %c0_14 = arith.constant 0 : index
    %31 = vector.load %arg4[%c0_13, %c0_14] : memref<256x32xbf16, #tpu.memory_space<vmem>>, vector<256x32xbf16>
    %cst_15 = arith.constant dense<0.000000e+00> : vector<8x32xf32>
    %32 = tpu.matmul %30, %31, %cst_15 {dimension_numbers = #tpu.dot_dimension_numbers<[1], [0], [0], [1], [0, 0, 1, 1], [], []>} : vector<8x256xbf16>, vector<256x32xbf16>, vector<8x32xf32> -> vector<8x32xf32>
    %33 = arith.truncf %32 : vector<8x32xf32> to vector<8x32xbf16>
    %c0_16 = arith.constant 0 : index
    %c0_17 = arith.constant 0 : index
    %34 = vector.load %arg5[%c0_16, %c0_17] : memref<32x64xbf16, #tpu.memory_space<vmem>>, vector<32x64xbf16>
    %cst_18 = arith.constant dense<0.000000e+00> : vector<8x64xf32>
    %35 = tpu.matmul %33, %34, %cst_18 {dimension_numbers = #tpu.dot_dimension_numbers<[1], [0], [0], [1], [0, 0, 1, 1], [], []>} : vector<8x32xbf16>, vector<32x64xbf16>, vector<8x64xf32> -> vector<8x64xf32>
    %cst_19 = arith.constant dense<0.000000e+00> : vector<64xf32>
    %36 = vector.multi_reduction <add>, %35, %cst_19 [0] : vector<8x64xf32> to vector<64xf32>
    %37 = vector.shape_cast %36 : vector<64xf32> to vector<1x64xf32>
    %cst_20 = arith.constant 8.000000e+00 : f32
    %38 = vector.broadcast %cst_20 : f32 to vector<1x64xf32>
    %39 = arith.divf %37, %38 : vector<1x64xf32>
    %40 = arith.mulf %35, %35 : vector<8x64xf32>
    %cst_21 = arith.constant dense<0.000000e+00> : vector<64xf32>
    %41 = vector.multi_reduction <add>, %40, %cst_21 [0] : vector<8x64xf32> to vector<64xf32>
    %42 = vector.shape_cast %41 : vector<64xf32> to vector<1x64xf32>
    %cst_22 = arith.constant 8.000000e+00 : f32
    %43 = vector.broadcast %cst_22 : f32 to vector<1x64xf32>
    %44 = arith.divf %42, %43 : vector<1x64xf32>
    %45 = arith.mulf %39, %39 : vector<1x64xf32>
    %46 = arith.subf %44, %45 : vector<1x64xf32>
    %cst_23 = arith.constant 0.000000e+00 : f32
    %47 = vector.broadcast %cst_23 : f32 to vector<1x64xf32>
    %48 = arith.maximumf %46, %47 : vector<1x64xf32>
    %c0_24 = arith.constant 0 : index
    %c0_25 = arith.constant 0 : index
    %49 = vector.load %arg6[%c0_24, %c0_25] : memref<2x64xf32, #tpu.memory_space<vmem>>, vector<1x64xf32>
    %cst_26 = arith.constant 9.99999974E-6 : f32
    %50 = vector.broadcast %cst_26 : f32 to vector<1x64xf32>
    %51 = arith.addf %48, %50 : vector<1x64xf32>
    %52 = math.rsqrt %51 : vector<1x64xf32>
    %53 = arith.mulf %49, %52 : vector<1x64xf32>
    %c1_27 = arith.constant 1 : index
    %c0_28 = arith.constant 0 : index
    %54 = vector.load %arg6[%c1_27, %c0_28] : memref<2x64xf32, #tpu.memory_space<vmem>>, vector<1x64xf32>
    %55 = arith.mulf %39, %53 : vector<1x64xf32>
    %56 = arith.subf %54, %55 : vector<1x64xf32>
    %57 = vector.broadcast %53 : vector<1x64xf32> to vector<8x64xf32>
    %58 = arith.mulf %35, %57 : vector<8x64xf32>
    %59 = vector.broadcast %56 : vector<1x64xf32> to vector<8x64xf32>
    %60 = arith.addf %58, %59 : vector<8x64xf32>
    %cst_29 = arith.constant 0.000000e+00 : f32
    %61 = vector.broadcast %cst_29 : f32 to vector<8x64xf32>
    %62 = arith.maximumf %60, %61 : vector<8x64xf32>
    %63 = arith.truncf %62 : vector<8x64xf32> to vector<8x64xbf16>
    %c0_30 = arith.constant 0 : index
    %c0_31 = arith.constant 0 : index
    %64 = vector.load %arg7[%c0_30, %c0_31] : memref<64x8xbf16, #tpu.memory_space<vmem>>, vector<64x8xbf16>
    %cst_32 = arith.constant dense<0.000000e+00> : vector<8x8xf32>
    %65 = tpu.matmul %63, %64, %cst_32 {dimension_numbers = #tpu.dot_dimension_numbers<[1], [0], [0], [1], [0, 0, 1, 1], [], []>} : vector<8x64xbf16>, vector<64x8xbf16>, vector<8x8xf32> -> vector<8x8xf32>
    %c0_33 = arith.constant 0 : index
    %c0_34 = arith.constant 0 : index
    %66 = vector.load %arg8[%c0_33, %c0_34] : memref<8x8xf32, #tpu.memory_space<vmem>>, vector<8x8xf32>
    tpu.vector_store %arg8[%c0_33, %c0_34], %65 {strides = array<i32>} : memref<8x8xf32, #tpu.memory_space<vmem>>, vector<8x8xf32>,
    return
  }
  func.func @transform_0(%arg0: i32) -> (i32, i32) {
    %c0_i32 = arith.constant 0 : i32
    %c0_i32_0 = arith.constant 0 : i32
    %c0_i32_1 = arith.constant 0 : i32
    return %c0_i32, %c0_i32_0 : i32, i32
  }
  func.func @transform_1(%arg0: i32) -> (i32, i32) {
    %c0_i32 = arith.constant 0 : i32
    %c0_i32_0 = arith.constant 0 : i32
    %c0_i32_1 = arith.constant 0 : i32
    return %c0_i32, %c0_i32_0 : i32, i32
  }
  func.func @transform_2(%arg0: i32) -> (i32, i32) {
    %c0_i32 = arith.constant 0 : i32
    %c0_i32_0 = arith.constant 0 : i32
    %c0_i32_1 = arith.constant 0 : i32
    return %c0_i32, %c0_i32_0 : i32, i32
  }
  func.func @transform_3(%arg0: i32) -> (i32, i32) {
    %c0_i32 = arith.constant 0 : i32
    %c0_i32_0 = arith.constant 0 : i32
    %c0_i32_1 = arith.constant 0 : i32
    return %c0_i32, %c0_i32_0 : i32, i32
  }
  func.func @transform_4(%arg0: i32) -> (i32, i32) {
    %c0_i32 = arith.constant 0 : i32
    %c0_i32_0 = arith.constant 0 : i32
    %c0_i32_1 = arith.constant 0 : i32
    return %c0_i32, %c0_i32_0 : i32, i32
  }
  func.func @transform_5(%arg0: i32) -> (i32, i32) {
    %c0_i32 = arith.constant 0 : i32
    %c0_i32_0 = arith.constant 0 : i32
    %c0_i32_1 = arith.constant 0 : i32
    return %c0_i32, %c0_i32_0 : i32, i32
  }
  func.func @transform_6(%arg0: i32) -> (i32, i32) {
    %c0_i32 = arith.constant 0 : i32
    %c0_i32_0 = arith.constant 0 : i32
    %c0_i32_1 = arith.constant 0 : i32
    return %c0_i32, %c0_i32_0 : i32, i32
  }
  func.func @transform_7(%arg0: i32) -> (i32, i32) {
    %c0_i32 = arith.constant 0 : i32
    %c0_i32_0 = arith.constant 0 : i32
    %c0_i32_1 = arith.constant 0 : i32
    return %c0_i32, %c0_i32_0 : i32, i32
  }
}

</mosaic_0001>

<bundles_post_ra>
// kernel: tpu_custom_call.1
= control target key start
LH: loop header
LB: loop body
LE: loop exit
PB: predicated region body
PF: predicated region fallthrough
CT: control target
= control target key end

     0   :  { %vm41_vm0 = vcmask 130048   ;;  %v696_v2 = vmov 0   ;;  %s862_s0 = inlined_call_operand.vmem [shape: bf16[8,16], index: 0, kind: input, shape index: {}]   ;;  %s863_s1 = inlined_call_operand.vmem [shape: bf16[16,256], index: 1, kind: input, shape index: {}]   ;;  %s864_s2 = inlined_call_operand.vmem [shape: f32[2,256], index: 2, kind: input, shape index: {}]   ;;  %s865_s3 = inlined_call_operand.vmem [shape: bf16[256,32], index: 3, kind: input, shape index: {}]   ;;  %s866_s4 = inlined_call_operand.vmem [shape: bf16[32,64], index: 4, kind: input, shape index: {}]   ;;  %s867_s5 = inlined_call_operand.vmem [shape: f32[2,64], index: 5, kind: input, shape index: {}]   ;;  %s868_s6 = inlined_call_operand.vmem [shape: bf16[64,8], index: 6, kind: input, shape index: {}]   ;;  %s869_s7 = inlined_call_operand.hbm [shape: f32[8,8], index: 7, kind: output, shape index: {}]  }
   0x1   :  { %v643_v0 = vld [vmem:[%s863_s1 + $0x4] ss:$8 sps:$4 sm:$0xff]   ;;  %v645_v1 = vld [vmem:[%s863_s1] ss:$8 sps:$4 sm:$0xff]   ;;  %77 = vmatprep.mubr.bf16.mxu0 %v696_v2 }
   0x2   :  { %v28_v3 = vld [vmem:[%s862_s0] sm:$0xf]  ;;  %59 = vmatprep.subr.bf16.mxu0 %v643_v0 }
   0x3   :  { %60 = vmatpush1.bf16.msra.mxu0 %v645_v1 }
   0x6   :  { %562 = vmatmul.mubr.msk.bf16.vlgmr.msra.gmra.mxu0 %vm41_vm0, %v28_v3 }
   0x7   :  { %12 = vsyncpa [#allocation3], 0  ;;  %v646_v4 = vld [vmem:[%s865_s3 + $0x78] sm:$0xff]   ;;  %v648_v6 = vld [vmem:[%s865_s3 + $0x70] sm:$0xff]   ;;  %v697_v21 = vmov 0.0   ;;  %v134_v2 = vlaneseq  ;;  %vm699_vm1 = vmmov 0  }
   0x8   :  { %v647_v5 = vld [vmem:[%s865_s3 + $0x38] sm:$0xff]   ;;  %588 = vmatprep.subr.bf16.mxu1 %v646_v4  ;;  %v649_v7 = vld [vmem:[%s865_s3 + $0x30] sm:$0xff]   ;;  %v650_v8 = vld [vmem:[%s865_s3 + $0x68] sm:$0xff]   ;;  %618 = vmatprep.subr.bf16.mxu0 %v697_v21  ;;  %v698_v0 = vmov 1966171168   ;;  %vm385_vm2 = vcmask 261120  }
   0x9   :  { %589 = vmatpush3.bf16.msra.mxu1 %v647_v5  ;;  %v651_v9 = vld [vmem:[%s865_s3 + $0x28] sm:$0xff]   ;;  %v652_v10 = vld [vmem:[%s865_s3 + $0x60] sm:$0xff]   ;;  %v654_v12 = vld [vmem:[%s865_s3 + $0x58] sm:$0xff]   ;;  %v132_v1 = vunpack.c.l.s4 %v698_v0  ;;  %v135_v4 = vshrl.u32 %v134_v2, 7  ;;  %622 = vmatprep.mubr.msk.bf16.mxu0 %vm699_vm1, %v697_v21  ;;  %vm429_vm3 = vcmask 523264   ;;  %s700_s28 = smov [#allocation2]  }
   0xa   :  { %590 = vmatprep.subr.bf16.mxu1 %v648_v6  ;;  %v653_v11 = vld [vmem:[%s865_s3 + $0x20] sm:$0xff]   ;;  %v655_v13 = vld [vmem:[%s865_s3 + $0x18] sm:$0xff]   ;;  %v656_v14 = vld [vmem:[%s865_s3 + $0x50] sm:$0xff]   ;;  %s552_s29 = sshll.u32 %s700_s28, 4  ;;  %vm544_vm4 = vcmask 64512   ;;  %s553_s29 = int_to_ptr.vmem [resolvable:$true] %s552_s29 }
   0xb   :  { %v657_v15 = vld [vmem:[%s865_s3 + $0x10] sm:$0xff]   ;;  %v658_v16 = vld [vmem:[%s865_s3 + $0x48] sm:$0xff]   ;;  %v660_v18 = vld [vmem:[%s865_s3 + $0x40] sm:$0xff]   ;;  %v133_v3 = vunpack.c.0.s8 %v132_v1  ;;  %p679_p1 = scmp.lt.s32.totalorder %s553_s29, %s553_s29 }
   0xc   :  { %v659_v17 = vld [vmem:[%s865_s3 + $0x8] sm:$0xff]   ;;  %v661_v19 = vld [vmem:[%s865_s3] sm:$0xff]  }
   0xd   :  { %591 = vmatpush3.bf16.msra.mxu1 %v649_v7  ;;  %v662_v20 = vld [vmem:[%s866_s4 + $0x8] sm:$0xff]   ;;  %v136_v6 = vsub.s32 %v133_v3, %v135_v4 }
   0xe   :  { %592 = vmatprep.subr.bf16.mxu1 %v650_v8  ;;  %619 = vmatpush3.bf16.msra.mxu0 %v662_v20 }
   0xf   :  { %620 = vmatprep.subr.bf16.mxu0 %v697_v21 }
  0x11   :  { %593 = vmatpush3.bf16.msra.mxu1 %v651_v9 }
  0x12   :  { %594 = vmatprep.subr.bf16.mxu1 %v652_v10  ;;  %v123_v10 = vld [vmem:[%s864_s2] ss:$2 sm:$0x3] }
  0x15   :  { %595 = vmatpush3.bf16.msra.mxu1 %v653_v11 }
  0x16   :  { %596 = vmatprep.subr.bf16.mxu1 %v654_v12  ;;  %v818_v12 = vsub.s32 0, %v135_v4 }
  0x19   :  { %597 = vmatpush3.bf16.msra.mxu1 %v655_v13  ;;  %v156_v13 = vsub.s32 1, %v135_v4 }
  0x1a   :  { %598 = vmatprep.subr.bf16.mxu1 %v656_v14 }
  0x1d   :  { %599 = vmatpush3.bf16.msra.mxu1 %v657_v15 }
  0x1e   :  { %600 = vmatprep.subr.bf16.mxu1 %v658_v16 }
  0x21   :  { %601 = vmatpush3.bf16.msra.mxu1 %v659_v17 }
  0x22   :  { %602 = vmatprep.subr.bf16.mxu1 %v660_v18 }
  0x25   :  { %603 = vmatpush3.bf16.msra.mxu1 %v661_v19 }
  0xc6   :  { %v803_v22 = vpop.f32.mrf.mxu0 }
  0xc7   :  { %v86_v23 = vrot.slane %v803_v22, 4  ;;  %v101_v24 = vmul.f32 %v803_v22, %v803_v22 }
  0xc8   :  { %v808_v25 = vpop.f32.mrf.mxu0 }
  0xc9   :  { %v87_v26 = vadd.f32 %v86_v23, %v803_v22  ;;  %v103_v27 = vrot.slane %v101_v24, 4  ;;  %v92_v28 = vrot.slane %v808_v25, 4  ;;  %v102_v29 = vmul.f32 %v808_v25, %v808_v25  ;;  %v563_v23 = vld [vmem:[%s864_s2 + $0x1] ss:$2 sm:$0x3] }
  0xca   :  { %v83_v30 = vpop.f32.mrf.mxu0 }
  0xcb   :  { %v88_v31 = vrot.slane %v87_v26, 2  ;;  %v104_v32 = vadd.f32 %v103_v27, %v101_v24  ;;  %v93_v33 = vadd.f32 %v92_v28, %v808_v25  ;;  %v109_v34 = vrot.slane %v102_v29, 4 }
  0xcc   :  { %v84_v35 = vpop.f32.mrf.mxu0 }
  0xcd   :  { %v89_v36 = vadd.f32 %v88_v31, %v87_v26  ;;  %v105_v37 = vrot.slane %v104_v32, 2  ;;  %v94_v38 = vrot.slane %v93_v33, 2  ;;  %v110_v39 = vadd.f32 %v109_v34, %v102_v29 }
  0xcf   :  { %v90_v40 = vrot.slane %v89_v36, 1  ;;  %v106_v41 = vadd.f32 %v105_v37, %v104_v32  ;;  %v95_v42 = vadd.f32 %v94_v38, %v93_v33  ;;  %v111_v43 = vrot.slane %v110_v39, 2  ;;  %v663_v37 = vld [vmem:[%s866_s4] sm:$0xff]  }
  0xd0   :  { %621 = vmatpush3.bf16.msra.mxu0 %v663_v37 }
  0xd1   :  { %v91_v44 = vadd.f32 %v90_v40, %v89_v36  ;;  %v107_v45 = vrot.slane %v106_v41, 1  ;;  %v96_v46 = vrot.slane %v95_v42, 1  ;;  %v112_v47 = vadd.f32 %v111_v43, %v110_v39  ;;  %626 = vmatprep.subr.bf16.mxu0 %v697_v21  ;;  %v665_v43 = vld [vmem:[%s868_s6 + $0x10] sm:$0xff]  }
  0xd3   :  { %v99_v48 = vmul.f32 0.125, %v91_v44  ;;  %v108_v49 = vadd.f32 %v107_v45, %v106_v41  ;;  %v113_v50 = vrot.slane %v112_v47, 1  ;;  %v97_v51 = vadd.f32 %v96_v46, %v95_v42  ;;  %v664_v42 = vld [vmem:[%s868_s6 + $0x18] sm:$0xff]   ;;  %v666_v44 = vld [vmem:[%s868_s6 + $0x8] sm:$0xff]   ;;  %v667_v45 = vld [vmem:[%s868_s6] sm:$0xff]  }
  0xd5   :  { %v115_v52 = vmul.f32 0.125, %v108_v49  ;;  %v117_v53 = vmul.f32 %v99_v48, %v99_v48  ;;  %v114_v54 = vadd.f32 %v113_v50, %v112_v47  ;;  %v100_v55 = vmul.f32 0.125, %v97_v51 }
  0xd7   :  { %v119_v56 = vsub.f32 %v115_v52, %v117_v53  ;;  %v116_v57 = vmul.f32 0.125, %v114_v54  ;;  %v118_v58 = vmul.f32 %v100_v55, %v100_v55 }
  0xd9   :  { %v121_v59 = vmax.f32 %v119_v56, 0.0  ;;  %v120_v60 = vsub.f32 %v116_v57, %v118_v58 }
  0xdb   :  { %v124_v61 = vadd.f32 1e-05, %v121_v59  ;;  %v122_v62 = vmax.f32 %v120_v60, 0.0 }
  0xdd   :  { %v125_v63 = vadd.f32 1e-05, %v122_v62  ;;  %668 = vrsqrt.f32 %v124_v61 }
  0xdf   :  { %670 = vrsqrt.f32 %v125_v63 }
  0xea   :  { %v669_v5 = vpop.eup %668 }
  0xec   :  { %v671_v7 = vpop.eup %670 }
  0xed   :  { %v130_v8 = vcombine.low %v669_v5, %v671_v7 }
  0xef   :  { %v137_v9 = vrot.slane %v130_v8, %v136_v6 }
  0xf1   :  { %v144_v11 = vrot.slane %v137_v9, %v136_v6  ;;  %v454_v9 = vld [vmem:[%s867_s5 + $0x1] sm:$0x1] }
  0xf3   :  { %v146_v14 = vmul.f32 %v144_v11, %v123_v10 }
  0xf5   :  { %v153_v15 = vrot.slane %v146_v14, %v818_v12  ;;  %v157_v16 = vrot.slane %v146_v14, %v156_v13 }
  0xf7   :  { %v160_v17 = vmul.f32 %v153_v15, %v99_v48  ;;  %v161_v18 = vmul.f32 %v157_v16, %v100_v55  ;;  %v182_v27 = vmul.f32 %v157_v16, %v808_v25  ;;  %v181_v29 = vmul.f32 %v153_v15, %v803_v22 }
  0xf9   :  { %v164_v19 = vcombine.low %v160_v17, %v161_v18 }
  0xfb   :  { %v171_v20 = vrot.slane %v164_v19, %v136_v6 }
  0xfd   :  { %v178_v24 = vrot.slane %v171_v20, %v136_v6  ;;  %v450_v6 = vld [vmem:[%s867_s5] sm:$0x1]  ;;  %s674_s5 = scalar_lea.vmem %s553_s29, 128 }
  0xfe   :  { %p675_p0 = scmp.ne.s32.totalorder %s553_s29, %s674_s5  ;;  %p680_p2 = scmp.lt.s32.totalorder %s674_s5, %s674_s5 }
  0xff   :  { %v180_v26 = vsub.f32 %v563_v23, %v178_v24 }
 0x100   :  { %p681_p3 = por %p680_p2, %p679_p1 }
 0x101   :  { %v191_v28 = vrot.slane %v180_v26, %v156_v13  ;;  %v187_v30 = vrot.slane %v180_v26, %v818_v12 }
 0x102   :  { %p682_p4 = pnand %p681_p3, %p675_p0 }
 0x103   :  { %v195_v31 = vadd.f32 %v191_v28, %v182_v27  ;;  %v194_v32 = vadd.f32 %v187_v30, %v181_v29 }
 0x105   :  { %v197_v33 = vmax.f32 %v195_v31, 0.0  ;;  %v196_v34 = vmax.f32 %v194_v32, 0.0 }
 0x107   :  { %v199_v35 = vpack.c.bf16 %v197_v33, %v197_v33  ;;  %v198_v36 = vpack.c.bf16 %v196_v34, %v196_v34 }
 0x109   :  { %360 = vmatprep.mubr.bf16.mxu1 %v199_v35 }
 0x10a   :  { %361 = vmatmul.mubr.bf16.vlgmr.msra.gmra.mxu1 %v198_v36 }
 0x1ca   :  { %v604_v22 = vpop.f32.mrf.mxu1 }
 0x1cc   :  { %v605_v25 = vpop.f32.mrf.mxu1 }
 0x1cd   :  { %v606_v38 = vadd.f32 %v605_v25, %v604_v22 }
 0x1ce   :  { %v607_v39 = vpop.f32.mrf.mxu1 }
 0x1cf   :  { %v368_v40 = vpack.c.bf16 %v606_v38, %v606_v38 }
 0x1d0   :  { %v608_v41 = vpop.f32.mrf.mxu1 }
 0x1d1   :  { %623 = vmatmul.mubr.msk.bf16.vlgmr.msra.gmra.mxu0 %vm385_vm2, %v368_v40 }
 0x1d2   :  { %634 = vmatprep.mubr.msk.bf16.mxu0 %vm699_vm1, %v697_v21  ;;  %627 = vmatpush3.bf16.msra.mxu0 %v664_v42 }
 0x1d3   :  { %628 = vmatprep.subr.bf16.mxu0 %v697_v21 }
 0x1d6   :  { %629 = vmatpush3.bf16.msra.mxu0 %v665_v43 }
 0x1d7   :  { %630 = vmatprep.subr.bf16.mxu0 %v697_v21 }
 0x1da   :  { %631 = vmatpush3.bf16.msra.mxu0 %v666_v44 }
 0x1db   :  { %632 = vmatprep.subr.bf16.mxu0 %v697_v21 }
 0x1de   :  { %633 = vmatpush3.bf16.msra.mxu0 %v667_v45 }
 0x291   :  { %v423_v46 = vpop.f32.mrf.mxu0 }
 0x292   :  { %v430_v47 = vsel %vm429_vm3, %v423_v46, 0.0  ;;  %v438_v48 = vmul.f32 %v423_v46, %v423_v46 }
 0x293   :  { %v431_v49 = vrot.slane %v430_v47, 4  ;;  %v624_v50 = vpop.f32.mrf.mxu0 }
 0x294   :  { %v439_v51 = vsel %vm429_vm3, %v438_v48, 0.0 }
 0x295   :  { %v432_v52 = vadd.f32 %v431_v49, %v430_v47  ;;  %v440_v53 = vrot.slane %v439_v51, 4  ;;  %v426_v54 = vpop.f32.mrf.mxu0 }
 0x297   :  { %v433_v55 = vrot.slane %v432_v52, 2  ;;  %v441_v56 = vadd.f32 %v440_v53, %v439_v51  ;;  %v625_v21 = vpop.f32.mrf.mxu0 }
 0x299   :  { %v434_v57 = vadd.f32 %v433_v55, %v432_v52  ;;  %v442_v58 = vrot.slane %v441_v56, 2 }
 0x29b   :  { %v435_v59 = vrot.slane %v434_v57, 1  ;;  %v443_v60 = vadd.f32 %v442_v58, %v441_v56 }
 0x29d   :  { %v436_v61 = vadd.f32 %v435_v59, %v434_v57  ;;  %v444_v62 = vrot.slane %v443_v60, 1 }
 0x29f   :  { %v437_v63 = vmul.f32 0.125, %v436_v61  ;;  %v445_v0 = vadd.f32 %v444_v62, %v443_v60 }
 0x2a1   :  { %v446_v1 = vmul.f32 0.125, %v445_v0  ;;  %v447_v2 = vmul.f32 %v437_v63, %v437_v63 }
 0x2a3   :  { %v448_v3 = vsub.f32 %v446_v1, %v447_v2 }
 0x2a5   :  { %v449_v4 = vmax.f32 %v448_v3, 0.0 }
 0x2a7   :  { %v451_v5 = vadd.f32 1e-05, %v449_v4 }
 0x2a9   :  { %672 = vrsqrt.f32 %v451_v5 }
 0x2b6   :  { %v673_v7 = vpop.eup %672 }
 0x2b7   :  { %v453_v8 = vmul.f32 %v673_v7, %v450_v6 }
 0x2b9   :  { %v455_v10 = vmul.f32 %v453_v8, %v437_v63  ;;  %v460_v11 = vrot.slane %v453_v8, %v818_v12 }
 0x2bb   :  { %v456_v13 = vsub.f32 %v454_v9, %v455_v10  ;;  %v461_v14 = vmul.f32 %v460_v11, %v423_v46 }
 0x2bd   :  { %v465_v15 = vrot.slane %v456_v13, %v818_v12 }
 0x2bf   :  { %v466_v16 = vadd.f32 %v465_v15, %v461_v14 }
 0x2c1   :  { %v467_v17 = vmax.f32 %v466_v16, 0.0 }
 0x2c3   :  { %v468_v18 = vpack.c.bf16 %v467_v17, %v467_v17 }
 0x2c5   :  { %635 = vmatmul.mubr.msk.bf16.vlgmr.msra.gmra.mxu0 %vm429_vm3, %v468_v18 }
 0x385   :  { %v538_v19 = vpop.f32.mrf.mxu0 }
 0x386   :  { %545 = vst.msk [vmem:[#allocation2] sm:$0xff] %vm544_vm4, %v538_v19 }
 0x387   :  { %v636_v20 = vpop.f32.mrf.mxu0 }
 0x388   :  { %685 = shalt.err (!%p682_p4)
}
 0x389   :  { %555 = dma.vmem_to_hbm [thread:$0]  %s553_s29, 128, %s869_s7, [#allocation3]   ;;  %v541_v12 = vpop.f32.mrf.mxu0 }
 0x38b   :  { %v637_v23 = vpop.f32.mrf.mxu0 }
 0x38c   :  { %694 = dma.done.wait [#allocation3], 128  }
 0x38d   :  { %695 = vsyncadd [#allocation3], 4294967168 }
 0x38e   :  { %559 = vsyncpa [#allocation3], 1 }

</bundles_post_ra>
